<compile_context>
chip_gen: v6e
topology: v6e:2x2x1
jax: 0.10.0
libtpu: 0.0.40
codegen_flags: <defaults>
</compile_context>

<pallas_src>
import functools

import jax
import jax.numpy as jnp
from jax.experimental import pallas as pl
from jax.experimental.pallas import tpu as pltpu


def _round8(n):
    return -(-n // 8) * 8


def rnn_fc_kernel(x_ref, slab_ref, h0_ref, out_ref, hlast_ref,
                  xw_scr, h_all_scr, *, T, B, I, H, O, offs, use_bf16):
    """Whole forward pass in ONE gridless invocation.

    x_ref     : (B*T, I)  batch-major flattened input (row b*T + t == x[b, t, :])
    slab_ref  : (rows, H) packed weight slab (single DMA for all weights/biases):
                  rows [off_wih, off_wih+I)  = W_ih^T
                  rows [off_whh, off_whh+H)  = W_hh^T
                  row   off_b                = b_ih + b_hh
                  rows [off_wfc, off_wfc+H)  = W_fc^T  zero-padded to H columns
                  row   off_bfc              = b_fc    zero-padded to H columns
    h0_ref    : (B, H)    initial hidden state (aliased with hlast_ref's buffer)
    out_ref   : (B*T, O)  batch-major flattened output
    hlast_ref : (B, H)    final hidden state
    xw_scr    : (B*T, H)  VMEM scratch for the hoisted input projection
    h_all_scr : (B*T, H)  VMEM scratch buffering every timestep's hidden state
    """
    off_wih, off_whh, off_b, off_wfc, off_bfc = offs

    # ---- Hoisted input projection: ONE (B*T, I) @ (I, H) matmul + combined
    #      RNN bias, entirely off the serial recurrence path.  Written to VMEM
    #      so per-step reads use the idle load slot (no vreg sublane shuffles).
    wih = slab_ref[off_wih:off_wih + I, :]                       # (I, H)
    b = slab_ref[off_b:off_b + 1, :]                             # (1, H)
    xw_scr[...] = (jnp.dot(x_ref[...], wih, preferred_element_type=jnp.float32)
                   + b)

    whh = slab_ref[off_whh:off_whh + H, :]                       # (H, H)
    whh_mx = whh.astype(jnp.bfloat16) if use_bf16 else whh       # MXU operands only

    # ---- Serial recurrence, fully unrolled (T small & static).  Only a single
    #      (B, H) @ (H, H) matmul + tanh sits on the dependency chain per step.
    h = h0_ref[...]                                              # vreg-carried, f32
    for t in range(T):
        xt = xw_scr[pl.ds(t, B, stride=T), :]                    # rows {b*T + t}
        hw = jnp.dot(h.astype(whh_mx.dtype), whh_mx,
                     preferred_element_type=jnp.float32)
        h = jnp.tanh(xt + hw)                                    # add + tanh in f32
        h_all_scr[pl.ds(t, B, stride=T), :] = h                  # buffer for head

    hlast_ref[...] = h

    # ---- Hoisted FC head: ONE (B*T, H) @ (H, H-padded) matmul + bias,
    #      single (narrow, masked) store of the first O columns.
    wfc = slab_ref[off_wfc:off_wfc + H, :]                       # (H, H) zero-padded
    bfc = slab_ref[off_bfc:off_bfc + 1, :]                       # (1, H) zero-padded
    out = (jnp.dot(h_all_scr[...], wfc, preferred_element_type=jnp.float32)
           + bfc)
    out_ref[...] = out[:, :O].astype(out_ref.dtype)


def _pack_weight_slab(params, I, H, O):
    """Pack all weights/biases into one (rows, H) f32 slab, 8-aligned sections.

    Constant-folded by XLA under jit (params are compile-time constants here).
    """
    assert O <= H, "column-padded FC head assumes output_size <= hidden_size"
    off_wih = 0
    off_whh = off_wih + _round8(I)
    off_b = off_whh + _round8(H)
    off_wfc = off_b + 8
    off_bfc = off_wfc + _round8(H)
    rows = off_bfc + 8

    slab = jnp.zeros((rows, H), jnp.float32)
    slab = slab.at[off_wih:off_wih + I, :].set(params["w_ih"].T.astype(jnp.float32))
    slab = slab.at[off_whh:off_whh + H, :].set(params["w_hh"].T.astype(jnp.float32))
    slab = slab.at[off_b, :].set((params["b_ih"] + params["b_hh"]).astype(jnp.float32))
    slab = slab.at[off_wfc:off_wfc + H, :O].set(params["w_fc"].T.astype(jnp.float32))
    slab = slab.at[off_bfc, :O].set(params["b_fc"].astype(jnp.float32))
    offs = (off_wih, off_whh, off_b, off_wfc, off_bfc)
    return slab, offs


def rnn_1d_regression_forward(x, params, h_state=None, *,
                              use_bf16_recurrence=False):
    """x: (B, T, I) float32, batch_first like PyTorch.

    Returns (out: (B, T, O), h_state: (1, B, H)) — same as the torch module.
    """
    B, T, I = x.shape
    H = params["w_hh"].shape[0]
    O = params["w_fc"].shape[0]

    if h_state is None:
        h0 = jnp.zeros((B, H), jnp.float32)
    else:
        h0 = h_state.reshape(B, H).astype(jnp.float32)

    # Batch-major flatten: metadata-only reshape (contiguous), NO transpose.
    x_flat = x.astype(jnp.float32).reshape(B * T, I)
    slab, offs = _pack_weight_slab(params, I, H, O)

    kernel = functools.partial(rnn_fc_kernel, T=T, B=B, I=I, H=H, O=O,
                               offs=offs, use_bf16=use_bf16_recurrence)

    # Advisory cost hint for XLA's scheduler (latency-bound tiny custom call).
    flops = 2 * B * T * (I * H + H * H + H * H)   # proj + recurrence + padded head
    bytes_accessed = 4 * (x_flat.size + slab.size + h0.size + B * T * O + B * H)

    out_flat, h_last = pl.pallas_call(
        kernel,
        out_shape=(
            jax.ShapeDtypeStruct((B * T, O), jnp.float32),
            jax.ShapeDtypeStruct((B, H), jnp.float32),
        ),
        in_specs=[pl.BlockSpec(memory_space=pltpu.MemorySpace.VMEM)] * 3,
        out_specs=(
            pl.BlockSpec(memory_space=pltpu.MemorySpace.VMEM),
            pl.BlockSpec(memory_space=pltpu.MemorySpace.VMEM),
        ),
        scratch_shapes=[pltpu.VMEM((B * T, H), jnp.float32),
                        pltpu.VMEM((B * T, H), jnp.float32)],
        input_output_aliases={2: 1},          # h0 buffer reused for final hidden
        cost_estimate=pl.CostEstimate(flops=flops,
                                      transcendentals=B * T * H,
                                      bytes_accessed=bytes_accessed),
    )(x_flat, slab, h0)

    out = out_flat.reshape(B, T, O)           # metadata-only reshape (batch-major)
    return out, h_last[None]                  # (1, B, H)


def reference_forward(x, params, h_state=None):
    """Pure-JAX reference matching torch semantics (correctness check)."""
    w_ih, w_hh = params["w_ih"], params["w_hh"]
    b_ih, b_hh = params["b_ih"], params["b_hh"]
    w_fc, b_fc = params["w_fc"], params["b_fc"]
    B, T, _ = x.shape
    H = w_hh.shape[0]
    h = jnp.zeros((B, H), jnp.float32) if h_state is None else h_state[0]
    hs = []
    for t in range(T):
        h = jnp.tanh(x[:, t] @ w_ih.T + b_ih + h @ w_hh.T + b_hh)
        hs.append(h)
    hidden_out = jnp.stack(hs, axis=1)                 # (B, T, H)
    out = hidden_out @ w_fc.T + b_fc                   # (B, T, O)
    return out, h[None]


def init_params(key, input_size, hidden_size, output_size):
    """Deterministic init mirroring PyTorch default U(-1/sqrt(fan), 1/sqrt(fan))."""
    ks = jax.random.split(key, 6)
    k_rnn = 1.0 / jnp.sqrt(hidden_size)
    k_fc = 1.0 / jnp.sqrt(hidden_size)
    u = lambda k, shape, bnd: jax.random.uniform(k, shape, jnp.float32, -bnd, bnd)
    return {
        "w_ih": u(ks[0], (hidden_size, input_size), k_rnn),
        "w_hh": u(ks[1], (hidden_size, hidden_size), k_rnn),
        "b_ih": u(ks[2], (hidden_size,), k_rnn),
        "b_hh": u(ks[3], (hidden_size,), k_rnn),
        "w_fc": u(ks[4], (output_size, hidden_size), k_fc),
        "b_fc": u(ks[5], (output_size,), k_fc),
    }


if __name__ == "__main__":
    # Small shapes implied by the module: (batch, seq, input_size), batch_first.
    B, T, I, H, O = 2, 8, 4, 32, 2

    key = jax.random.PRNGKey(0)
    k_params, k_x, k_h = jax.random.split(key, 3)
    params = init_params(k_params, I, H, O)
    x = jax.random.normal(k_x, (B, T, I), jnp.float32)

    # Case 1: default f32 forward (h_state=None) — exact torch semantics.
    fwd = jax.jit(functools.partial(rnn_1d_regression_forward, params=params))
    out, h_state = jax.block_until_ready(fwd(x))
    out_ref, h_ref = reference_forward(x, params)
    assert out.shape == (B, T, O) and h_state.shape == (1, B, H)
    assert jnp.allclose(out, out_ref, atol=1e-5, rtol=1e-5)
    assert jnp.allclose(h_state, h_ref, atol=1e-5, rtol=1e-5)

    # Case 2: f32 forward with a provided h_state (as used by single_predict).
    h_in = 0.1 * jax.random.normal(k_h, (1, B, H), jnp.float32)
    fwd_h = jax.jit(lambda xx, hh: rnn_1d_regression_forward(xx, params, hh))
    out2, h2 = jax.block_until_ready(fwd_h(x, h_in))
    out2_ref, h2_ref = reference_forward(x, params, h_in)
    assert jnp.allclose(out2, out2_ref, atol=1e-5, rtol=1e-5)
    assert jnp.allclose(h2, h2_ref, atol=1e-5, rtol=1e-5)

    # Case 3: bf16-MXU-operand recurrence (perf option); relaxed tolerance.
    fwd_bf16 = jax.jit(functools.partial(rnn_1d_regression_forward,
                                         params=params,
                                         use_bf16_recurrence=True))
    out3, h3 = jax.block_until_ready(fwd_bf16(x))
    assert jnp.allclose(out3, out_ref, atol=5e-2, rtol=5e-2)
    assert jnp.allclose(h3, h_ref, atol=5e-2, rtol=5e-2)

    print("KERNEL_OK")
</pallas_src>

<mosaic_0001>
module attributes {stable_mosaic.version = 11 : i64} {
  func.func @rnn_fc_kernel(%arg0: memref<16x4xf32, #tpu.memory_space<vmem>>, %arg1: memref<88x32xf32, #tpu.memory_space<vmem>>, %arg2: memref<2x32xf32, #tpu.memory_space<vmem>>, %arg3: memref<16x2xf32, #tpu.memory_space<vmem>>, %arg4: memref<2x32xf32, #tpu.memory_space<vmem>>, %arg5: memref<16x32xf32, #tpu.memory_space<vmem>>, %arg6: memref<16x32xf32, #tpu.memory_space<vmem>>) attributes {dimension_semantics = [], scalar_prefetch = 0 : i64, scratch_operands = 2 : i64, tpu.core_type = #tpu.core_type<tc>} {
    %c0 = arith.constant 0 : index
    %c0_0 = arith.constant 0 : index
    %0 = vector.load %arg1[%c0, %c0_0] : memref<88x32xf32, #tpu.memory_space<vmem>>, vector<4x32xf32>
    %c40 = arith.constant 40 : index
    %c0_1 = arith.constant 0 : index
    %1 = vector.load %arg1[%c40, %c0_1] : memref<88x32xf32, #tpu.memory_space<vmem>>, vector<1x32xf32>
    %c0_2 = arith.constant 0 : index
    %c0_3 = arith.constant 0 : index
    %2 = vector.load %arg0[%c0_2, %c0_3] : memref<16x4xf32, #tpu.memory_space<vmem>>, vector<16x4xf32>
    %cst = arith.constant dense<0.000000e+00> : vector<16x32xf32>
    %3 = tpu.matmul %2, %0, %cst {dimension_numbers = #tpu.dot_dimension_numbers<[1], [0], [0], [1], [0, 0, 1, 1], [], []>} : vector<16x4xf32>, vector<4x32xf32>, vector<16x32xf32> -> vector<16x32xf32>
    %4 = vector.broadcast %1 : vector<1x32xf32> to vector<16x32xf32>
    %5 = arith.addf %3, %4 : vector<16x32xf32>
    %c0_4 = arith.constant 0 : index
    %c0_5 = arith.constant 0 : index
    %6 = vector.load %arg5[%c0_4, %c0_5] : memref<16x32xf32, #tpu.memory_space<vmem>>, vector<16x32xf32>
    tpu.vector_store %arg5[%c0_4, %c0_5], %5 {strides = array<i32>} : memref<16x32xf32, #tpu.memory_space<vmem>>, vector<16x32xf32>,
    %c8 = arith.constant 8 : index
    %c0_6 = arith.constant 0 : index
    %7 = vector.load %arg1[%c8, %c0_6] : memref<88x32xf32, #tpu.memory_space<vmem>>, vector<32x32xf32>
    %c0_7 = arith.constant 0 : index
    %c0_8 = arith.constant 0 : index
    %8 = vector.load %arg2[%c0_7, %c0_8] : memref<2x32xf32, #tpu.memory_space<vmem>>, vector<2x32xf32>
    %c0_9 = arith.constant 0 : index
    %c0_10 = arith.constant 0 : index
    %9 = tpu.strided_load %arg5[%c0_9, %c0_10] {strides = array<i32: 8, 1>} : memref<16x32xf32, #tpu.memory_space<vmem>>, vector<2x32xf32>
    %cst_11 = arith.constant dense<0.000000e+00> : vector<2x32xf32>
    %10 = tpu.matmul %8, %7, %cst_11 {dimension_numbers = #tpu.dot_dimension_numbers<[1], [0], [0], [1], [0, 0, 1, 1], [], []>} : vector<2x32xf32>, vector<32x32xf32>, vector<2x32xf32> -> vector<2x32xf32>
    %11 = arith.addf %9, %10 : vector<2x32xf32>
    %12 = math.tanh %11 : vector<2x32xf32>
    %c0_12 = arith.constant 0 : index
    %c0_13 = arith.constant 0 : index
    %13 = tpu.strided_load %arg6[%c0_12, %c0_13] {strides = array<i32: 8, 1>} : memref<16x32xf32, #tpu.memory_space<vmem>>, vector<2x32xf32>
    tpu.strided_store %arg6[%c0_12, %c0_13], %12 {strides = array<i32: 8, 1>} : memref<16x32xf32, #tpu.memory_space<vmem>>, vector<2x32xf32>
    %c1 = arith.constant 1 : index
    %c0_14 = arith.constant 0 : index
    %14 = tpu.strided_load %arg5[%c1, %c0_14] {strides = array<i32: 8, 1>} : memref<16x32xf32, #tpu.memory_space<vmem>>, vector<2x32xf32>
    %cst_15 = arith.constant dense<0.000000e+00> : vector<2x32xf32>
    %15 = tpu.matmul %12, %7, %cst_15 {dimension_numbers = #tpu.dot_dimension_numbers<[1], [0], [0], [1], [0, 0, 1, 1], [], []>} : vector<2x32xf32>, vector<32x32xf32>, vector<2x32xf32> -> vector<2x32xf32>
    %16 = arith.addf %14, %15 : vector<2x32xf32>
    %17 = math.tanh %16 : vector<2x32xf32>
    %c1_16 = arith.constant 1 : index
    %c0_17 = arith.constant 0 : index
    %18 = tpu.strided_load %arg6[%c1_16, %c0_17] {strides = array<i32: 8, 1>} : memref<16x32xf32, #tpu.memory_space<vmem>>, vector<2x32xf32>
    tpu.strided_store %arg6[%c1_16, %c0_17], %17 {strides = array<i32: 8, 1>} : memref<16x32xf32, #tpu.memory_space<vmem>>, vector<2x32xf32>
    %c2 = arith.constant 2 : index
    %c0_18 = arith.constant 0 : index
    %19 = tpu.strided_load %arg5[%c2, %c0_18] {strides = array<i32: 8, 1>} : memref<16x32xf32, #tpu.memory_space<vmem>>, vector<2x32xf32>
    %cst_19 = arith.constant dense<0.000000e+00> : vector<2x32xf32>
    %20 = tpu.matmul %17, %7, %cst_19 {dimension_numbers = #tpu.dot_dimension_numbers<[1], [0], [0], [1], [0, 0, 1, 1], [], []>} : vector<2x32xf32>, vector<32x32xf32>, vector<2x32xf32> -> vector<2x32xf32>
    %21 = arith.addf %19, %20 : vector<2x32xf32>
    %22 = math.tanh %21 : vector<2x32xf32>
    %c2_20 = arith.constant 2 : index
    %c0_21 = arith.constant 0 : index
    %23 = tpu.strided_load %arg6[%c2_20, %c0_21] {strides = array<i32: 8, 1>} : memref<16x32xf32, #tpu.memory_space<vmem>>, vector<2x32xf32>
    tpu.strided_store %arg6[%c2_20, %c0_21], %22 {strides = array<i32: 8, 1>} : memref<16x32xf32, #tpu.memory_space<vmem>>, vector<2x32xf32>
    %c3 = arith.constant 3 : index
    %c0_22 = arith.constant 0 : index
    %24 = tpu.strided_load %arg5[%c3, %c0_22] {strides = array<i32: 8, 1>} : memref<16x32xf32, #tpu.memory_space<vmem>>, vector<2x32xf32>
    %cst_23 = arith.constant dense<0.000000e+00> : vector<2x32xf32>
    %25 = tpu.matmul %22, %7, %cst_23 {dimension_numbers = #tpu.dot_dimension_numbers<[1], [0], [0], [1], [0, 0, 1, 1], [], []>} : vector<2x32xf32>, vector<32x32xf32>, vector<2x32xf32> -> vector<2x32xf32>
    %26 = arith.addf %24, %25 : vector<2x32xf32>
    %27 = math.tanh %26 : vector<2x32xf32>
    %c3_24 = arith.constant 3 : index
    %c0_25 = arith.constant 0 : index
    %28 = tpu.strided_load %arg6[%c3_24, %c0_25] {strides = array<i32: 8, 1>} : memref<16x32xf32, #tpu.memory_space<vmem>>, vector<2x32xf32>
    tpu.strided_store %arg6[%c3_24, %c0_25], %27 {strides = array<i32: 8, 1>} : memref<16x32xf32, #tpu.memory_space<vmem>>, vector<2x32xf32>
    %c4 = arith.constant 4 : index
    %c0_26 = arith.constant 0 : index
    %29 = tpu.strided_load %arg5[%c4, %c0_26] {strides = array<i32: 8, 1>} : memref<16x32xf32, #tpu.memory_space<vmem>>, vector<2x32xf32>
    %cst_27 = arith.constant dense<0.000000e+00> : vector<2x32xf32>
    %30 = tpu.matmul %27, %7, %cst_27 {dimension_numbers = #tpu.dot_dimension_numbers<[1], [0], [0], [1], [0, 0, 1, 1], [], []>} : vector<2x32xf32>, vector<32x32xf32>, vector<2x32xf32> -> vector<2x32xf32>
    %31 = arith.addf %29, %30 : vector<2x32xf32>
    %32 = math.tanh %31 : vector<2x32xf32>
    %c4_28 = arith.constant 4 : index
    %c0_29 = arith.constant 0 : index
    %33 = tpu.strided_load %arg6[%c4_28, %c0_29] {strides = array<i32: 8, 1>} : memref<16x32xf32, #tpu.memory_space<vmem>>, vector<2x32xf32>
    tpu.strided_store %arg6[%c4_28, %c0_29], %32 {strides = array<i32: 8, 1>} : memref<16x32xf32, #tpu.memory_space<vmem>>, vector<2x32xf32>
    %c5 = arith.constant 5 : index
    %c0_30 = arith.constant 0 : index
    %34 = tpu.strided_load %arg5[%c5, %c0_30] {strides = array<i32: 8, 1>} : memref<16x32xf32, #tpu.memory_space<vmem>>, vector<2x32xf32>
    %cst_31 = arith.constant dense<0.000000e+00> : vector<2x32xf32>
    %35 = tpu.matmul %32, %7, %cst_31 {dimension_numbers = #tpu.dot_dimension_numbers<[1], [0], [0], [1], [0, 0, 1, 1], [], []>} : vector<2x32xf32>, vector<32x32xf32>, vector<2x32xf32> -> vector<2x32xf32>
    %36 = arith.addf %34, %35 : vector<2x32xf32>
    %37 = math.tanh %36 : vector<2x32xf32>
    %c5_32 = arith.constant 5 : index
    %c0_33 = arith.constant 0 : index
    %38 = tpu.strided_load %arg6[%c5_32, %c0_33] {strides = array<i32: 8, 1>} : memref<16x32xf32, #tpu.memory_space<vmem>>, vector<2x32xf32>
    tpu.strided_store %arg6[%c5_32, %c0_33], %37 {strides = array<i32: 8, 1>} : memref<16x32xf32, #tpu.memory_space<vmem>>, vector<2x32xf32>
    %c6 = arith.constant 6 : index
    %c0_34 = arith.constant 0 : index
    %39 = tpu.strided_load %arg5[%c6, %c0_34] {strides = array<i32: 8, 1>} : memref<16x32xf32, #tpu.memory_space<vmem>>, vector<2x32xf32>
    %cst_35 = arith.constant dense<0.000000e+00> : vector<2x32xf32>
    %40 = tpu.matmul %37, %7, %cst_35 {dimension_numbers = #tpu.dot_dimension_numbers<[1], [0], [0], [1], [0, 0, 1, 1], [], []>} : vector<2x32xf32>, vector<32x32xf32>, vector<2x32xf32> -> vector<2x32xf32>
    %41 = arith.addf %39, %40 : vector<2x32xf32>
    %42 = math.tanh %41 : vector<2x32xf32>
    %c6_36 = arith.constant 6 : index
    %c0_37 = arith.constant 0 : index
    %43 = tpu.strided_load %arg6[%c6_36, %c0_37] {strides = array<i32: 8, 1>} : memref<16x32xf32, #tpu.memory_space<vmem>>, vector<2x32xf32>
    tpu.strided_store %arg6[%c6_36, %c0_37], %42 {strides = array<i32: 8, 1>} : memref<16x32xf32, #tpu.memory_space<vmem>>, vector<2x32xf32>
    %c7 = arith.constant 7 : index
    %c0_38 = arith.constant 0 : index
    %44 = tpu.strided_load %arg5[%c7, %c0_38] {strides = array<i32: 8, 1>} : memref<16x32xf32, #tpu.memory_space<vmem>>, vector<2x32xf32>
    %cst_39 = arith.constant dense<0.000000e+00> : vector<2x32xf32>
    %45 = tpu.matmul %42, %7, %cst_39 {dimension_numbers = #tpu.dot_dimension_numbers<[1], [0], [0], [1], [0, 0, 1, 1], [], []>} : vector<2x32xf32>, vector<32x32xf32>, vector<2x32xf32> -> vector<2x32xf32>
    %46 = arith.addf %44, %45 : vector<2x32xf32>
    %47 = math.tanh %46 : vector<2x32xf32>
    %c7_40 = arith.constant 7 : index
    %c0_41 = arith.constant 0 : index
    %48 = tpu.strided_load %arg6[%c7_40, %c0_41] {strides = array<i32: 8, 1>} : memref<16x32xf32, #tpu.memory_space<vmem>>, vector<2x32xf32>
    tpu.strided_store %arg6[%c7_40, %c0_41], %47 {strides = array<i32: 8, 1>} : memref<16x32xf32, #tpu.memory_space<vmem>>, vector<2x32xf32>
    %c0_42 = arith.constant 0 : index
    %c0_43 = arith.constant 0 : index
    %49 = vector.load %arg4[%c0_42, %c0_43] : memref<2x32xf32, #tpu.memory_space<vmem>>, vector<2x32xf32>
    tpu.vector_store %arg4[%c0_42, %c0_43], %47 {strides = array<i32>} : memref<2x32xf32, #tpu.memory_space<vmem>>, vector<2x32xf32>,
    %c48 = arith.constant 48 : index
    %c0_44 = arith.constant 0 : index
    %50 = vector.load %arg1[%c48, %c0_44] : memref<88x32xf32, #tpu.memory_space<vmem>>, vector<32x32xf32>
    %c80 = arith.constant 80 : index
    %c0_45 = arith.constant 0 : index
    %51 = vector.load %arg1[%c80, %c0_45] : memref<88x32xf32, #tpu.memory_space<vmem>>, vector<1x32xf32>
    %c0_46 = arith.constant 0 : index
    %c0_47 = arith.constant 0 : index
    %52 = vector.load %arg6[%c0_46, %c0_47] : memref<16x32xf32, #tpu.memory_space<vmem>>, vector<16x32xf32>
    %cst_48 = arith.constant dense<0.000000e+00> : vector<16x32xf32>
    %53 = tpu.matmul %52, %50, %cst_48 {dimension_numbers = #tpu.dot_dimension_numbers<[1], [0], [0], [1], [0, 0, 1, 1], [], []>} : vector<16x32xf32>, vector<32x32xf32>, vector<16x32xf32> -> vector<16x32xf32>
    %54 = vector.broadcast %51 : vector<1x32xf32> to vector<16x32xf32>
    %55 = arith.addf %53, %54 : vector<16x32xf32>
    %56 = vector.extract_strided_slice %55 {offsets = [0, 0], sizes = [16, 2], strides = [1, 1]} : vector<16x32xf32> to vector<16x2xf32>
    %c0_49 = arith.constant 0 : index
    %c0_50 = arith.constant 0 : index
    %57 = vector.load %arg3[%c0_49, %c0_50] : memref<16x2xf32, #tpu.memory_space<vmem>>, vector<16x2xf32>
    tpu.vector_store %arg3[%c0_49, %c0_50], %56 {strides = array<i32>} : memref<16x2xf32, #tpu.memory_space<vmem>>, vector<16x2xf32>,
    return
  }
}

</mosaic_0001>

<bundles_post_ra>
// kernel: rnn_1d_regression_forward.1
= control target key start
LH: loop header
LB: loop body
LE: loop exit
PB: predicated region body
PF: predicated region fallthrough
CT: control target
= control target key end

     0   :  { %10 = vsyncpa [#allocation5], 0  ;;  %s1087_s15 = smov [#allocation4]   ;;  %s1238_s0 = inlined_call_operand.vmem [shape: f32[16,4], index: 0, kind: input, shape index: {}]   ;;  %s1239_s1 = inlined_call_operand.hbm [shape: f32[88,32], index: 1, kind: input, shape index: {}]   ;;  %s1240_s2 = inlined_call_operand.vmem [shape: f32[2,32], index: 2, kind: input, shape index: {}, may-alias: {2,4}]   ;;  %s1241_s3 = inlined_call_operand.vmem [shape: f32[16,2], index: 3, kind: output, shape index: {0}]   ;;  %s1242_s4 = inlined_call_operand.vmem [shape: f32[2,32], index: 4, kind: output, shape index: {1}, may-alias: {2,4}]  }
   0x1   :  { %s18_s16 = sshll.u32 %s1087_s15, 4  ;;  %s19_s16 = int_to_ptr.vmem [resolvable:$true] %s18_s16 }
   0x2   :  { %s1073_s17 = scalar_lea.vmem %s19_s16, 1408  ;;  %p1078_p1 = scmp.lt.s32.totalorder %s19_s16, %s19_s16 }
   0x3   :  { %p1074_p0 = scmp.ne.s32.totalorder %s19_s16, %s1073_s17  ;;  %p1079_p2 = scmp.lt.s32.totalorder %s1073_s17, %s1073_s17 }
   0x5   :  { %p1080_p3 = por %p1079_p2, %p1078_p1 }
   0x7   :  { %p1081_p4 = pnand %p1080_p3, %p1074_p0 }
   0x9   :  { %1084 = shalt.err (!%p1081_p4)
}
   0xa   :  { %s1088_s18 = smov 128   ;;  %s1089_s19 = smov 8  }
   0xb   :  { %24 = dma.hbm_to_vmem [thread:$0]  %s1239_s1, 1408, %s19_s16, [#allocation5], %s1088_s18, %s1088_s18, %s1089_s19  }
   0xc   :  { %1085 = dma.done.wait [#allocation5], 1408  }
   0xd   :  { %1086 = vsyncadd [#allocation5], 4294965888  ;;  %v1090_v0 = vmov 0.0   ;;  %vm1091_vm0 = vmmov 0   ;;  %vm45_vm1 = vcmask 1043456   ;;  %vm38_vm2 = vcmask 31744  }
   0xe   :  { %945 = vmatprep.subr.mxu1 %v1090_v0  ;;  %953 = vmatprep.mubr.msk.f32.mxu1 %vm1091_vm0, %v1090_v0  ;;  %v30_v1 = vld [vmem:[#allocation4] sm:$0xf]  ;;  %v33_v3 = vld [vmem:[%s1238_s0 + $0x8] sm:$0xff]  ;;  %v1131_v5 = vld [vmem:[#allocation4 + $0x18] sm:$0xff]  ;;  %vm124_vm3 = vcmask 261120   ;;  %vm770_vm4 = vcmask 254976  }
   0xf   :  { %v32_v2 = vld [vmem:[%s1238_s0] sm:$0xff]  ;;  %940 = vmatprep.subr.msk.mxu0 %vm45_vm1, %v30_v1  ;;  %v1135_v6 = vld [vmem:[#allocation4 + $0x10] sm:$0xff]  ;;  %v1140_v7 = vld [vmem:[#allocation4 + $0x8] sm:$0xff]  ;;  %vm864_vm5 = vcmask 15360  }
  0x10   :  { %942 = vmatprep.mubr.msk.f32.mxu0 %vm38_vm2, %v32_v2  ;;  %v1129_v4 = vld [vmem:[#allocation4 + $0x20] sm:$0xff]  ;;  %941 = vmatpush3.msk.msra.mxu0 %vm45_vm1, %v30_v1  ;;  %v876_v9 = vld [vmem:[#allocation4 + $0x28] ss:$0 sm:$0xff]  ;;  %v773_v51 = vld [vmem:[#allocation4 + $0x38] sm:$0xff] }
  0x11   :  { %946 = vmatpush3.msra.mxu1 %v1129_v4  ;;  %943 = vmatmul.mubr.msk.f32.vlgmr.msra.gmra.mxu0 %vm38_vm2, %v33_v3  ;;  %v131_v8 = vld [vmem:[%s1240_s2] sm:$0x3]  ;;  %v775_v49 = vld [vmem:[#allocation4 + $0x48] sm:$0xff]  ;;  %v772_v52 = vld [vmem:[#allocation4 + $0x30] sm:$0xff] }
  0x12   :  { %947 = vmatprep.subr.mxu1 %v1090_v0  ;;  %956 = vmatprep.subr.mxu0 %v1090_v0  ;;  %v774_v50 = vld [vmem:[#allocation4 + $0x40] sm:$0xff]  ;;  %v888_v60 = vld [vmem:[#allocation4 + $0x50] ss:$0 sm:$0xff] }
  0x13   :  { %948 = vmatpush3.msra.mxu1 %v1131_v5  ;;  %957 = vmatpush3.msra.mxu0 %v1129_v4 }
  0x14   :  { %949 = vmatprep.subr.mxu1 %v1090_v0  ;;  %958 = vmatprep.subr.mxu0 %v1090_v0 }
  0x15   :  { %950 = vmatpush3.msra.mxu1 %v1135_v6  ;;  %959 = vmatpush3.msra.mxu0 %v1131_v5 }
  0x16   :  { %951 = vmatprep.subr.mxu1 %v1090_v0  ;;  %960 = vmatprep.subr.mxu0 %v1090_v0 }
  0x17   :  { %952 = vmatpush3.msra.mxu1 %v1140_v7  ;;  %961 = vmatpush3.msra.mxu0 %v1135_v6 }
  0x18   :  { %954 = vmatmul.mubr.msk.f32.vlgmr.msra.gmra.mxu1 %vm124_vm3, %v131_v8  ;;  %962 = vmatprep.subr.mxu0 %v1090_v0 }
  0x19   :  { %964 = vmatprep.mubr.msk.f32.mxu0 %vm1091_vm0, %v1090_v0  ;;  %963 = vmatpush3.msra.mxu0 %v1140_v7 }
  0x1a   :  { %967 = vmatprep.subr.mxu1 %v1090_v0  ;;  %975 = vmatprep.mubr.msk.f32.mxu1 %vm1091_vm0, %v1090_v0 }
  0x1b   :  { %968 = vmatpush3.msra.mxu1 %v1129_v4  ;;  %978 = vmatprep.subr.mxu0 %v1090_v0 }
  0x1c   :  { %969 = vmatprep.subr.mxu1 %v1090_v0 }
  0x1d   :  { %970 = vmatpush3.msra.mxu1 %v1131_v5 }
  0x1e   :  { %971 = vmatprep.subr.mxu1 %v1090_v0 }
  0x1f   :  { %972 = vmatpush3.msra.mxu1 %v1135_v6 }
  0x20   :  { %973 = vmatprep.subr.mxu1 %v1090_v0 }
  0x21   :  { %974 = vmatpush3.msra.mxu1 %v1140_v7 }
  0x22   :  { %989 = vmatprep.subr.mxu1 %v1090_v0 }
  0xd1   :  { %v944_v10 = vpop.f32.mrf.mxu0 }
  0xd2   :  { %v121_v11 = vadd.f32 %v944_v10, %v876_v9 }
  0xd3   :  { %v115_v12 = vpop.f32.mrf.mxu0 }
  0xd4   :  { %126 = vst.msk [vmem:[#allocation2 + $0x8] sm:$0xff] %vm124_vm3, %v121_v11  ;;  %v116_v13 = vadd.f32 %v876_v9, %v115_v12 }
  0xd6   :  { %125 = vst.msk [vmem:[#allocation2] sm:$0xff] %vm124_vm3, %v116_v13 }
  0xd8   :  { %v202_v14 = vpop.f32.mrf.mxu1 }
  0xda   :  { %v955_v15 = vpop.f32.mrf.mxu1 }
  0xdd   :  { %v132_v16 = vld [vmem:[#allocation2] ss:$8 sm:$0x3]  ;;  %v211_v19 = vld [vmem:[#allocation2 + $0x1] ss:$8 sm:$0x3] }
  0xde   :  { %v206_v17 = vadd.f32 %v202_v14, %v132_v16  ;;  %v291_v24 = vld [vmem:[#allocation2 + $0x2] ss:$8 sm:$0x3]  ;;  %v371_v29 = vld [vmem:[#allocation2 + $0x3] ss:$8 sm:$0x3] }
  0xdf   :  { %v451_v34 = vld [vmem:[#allocation2 + $0x4] ss:$8 sm:$0x3]  ;;  %v531_v39 = vld [vmem:[#allocation2 + $0x5] ss:$8 sm:$0x3] }
  0xe0   :  { %1049 = vtanh.f32 %v206_v17  ;;  %v611_v44 = vld [vmem:[#allocation2 + $0x6] ss:$8 sm:$0x3]  ;;  %v691_v53 = vld [vmem:[#allocation2 + $0x7] ss:$8 sm:$0x3] }
  0xed   :  { %v1050_v18 = vpop.eup %1049 }
  0xee   :  { %208 = vst [vmem:[#allocation3] ss:$8 sm:$0x3] %v1050_v18  ;;  %965 = vmatmul.mubr.msk.f32.vlgmr.msra.gmra.mxu0 %vm124_vm3, %v1050_v18 }
  0xef   :  { %979 = vmatpush3.msra.mxu0 %v1129_v4  ;;  %986 = vmatprep.mubr.msk.f32.mxu0 %vm1091_vm0, %v1090_v0 }
  0xf0   :  { %980 = vmatprep.subr.mxu0 %v1090_v0 }
  0xf1   :  { %981 = vmatpush3.msra.mxu0 %v1131_v5 }
  0xf2   :  { %982 = vmatprep.subr.mxu0 %v1090_v0 }
  0xf3   :  { %983 = vmatpush3.msra.mxu0 %v1135_v6 }
  0xf4   :  { %984 = vmatprep.subr.mxu0 %v1090_v0 }
  0xf5   :  { %985 = vmatpush3.msra.mxu0 %v1140_v7 }
  0xf6   :  { %1000 = vmatprep.subr.mxu0 %v1090_v0 }
 0x1ae   :  { %v281_v20 = vpop.f32.mrf.mxu0 }
 0x1af   :  { %v285_v21 = vadd.f32 %v281_v20, %v211_v19 }
 0x1b0   :  { %v966_v22 = vpop.f32.mrf.mxu0 }
 0x1b1   :  { %1051 = vtanh.f32 %v285_v21 }
 0x1be   :  { %v1052_v23 = vpop.eup %1051 }
 0x1bf   :  { %288 = vst [vmem:[#allocation3 + $0x1] ss:$8 sm:$0x3] %v1052_v23  ;;  %976 = vmatmul.mubr.msk.f32.vlgmr.msra.gmra.mxu1 %vm124_vm3, %v1052_v23 }
 0x1c0   :  { %990 = vmatpush3.msra.mxu1 %v1129_v4  ;;  %997 = vmatprep.mubr.msk.f32.mxu1 %vm1091_vm0, %v1090_v0 }
 0x1c1   :  { %991 = vmatprep.subr.mxu1 %v1090_v0 }
 0x1c2   :  { %992 = vmatpush3.msra.mxu1 %v1131_v5 }
 0x1c3   :  { %993 = vmatprep.subr.mxu1 %v1090_v0 }
 0x1c4   :  { %994 = vmatpush3.msra.mxu1 %v1135_v6 }
 0x1c5   :  { %995 = vmatprep.subr.mxu1 %v1090_v0 }
 0x1c6   :  { %996 = vmatpush3.msra.mxu1 %v1140_v7 }
 0x1c7   :  { %1011 = vmatprep.subr.mxu1 %v1090_v0 }
 0x27f   :  { %v361_v25 = vpop.f32.mrf.mxu1 }
 0x280   :  { %v365_v26 = vadd.f32 %v361_v25, %v291_v24 }
 0x281   :  { %v977_v27 = vpop.f32.mrf.mxu1 }
 0x282   :  { %1053 = vtanh.f32 %v365_v26 }
 0x28f   :  { %v1054_v28 = vpop.eup %1053 }
 0x290   :  { %368 = vst [vmem:[#allocation3 + $0x2] ss:$8 sm:$0x3] %v1054_v28  ;;  %987 = vmatmul.mubr.msk.f32.vlgmr.msra.gmra.mxu0 %vm124_vm3, %v1054_v28 }
 0x291   :  { %1001 = vmatpush3.msra.mxu0 %v1129_v4  ;;  %1008 = vmatprep.mubr.msk.f32.mxu0 %vm1091_vm0, %v1090_v0 }
 0x292   :  { %1002 = vmatprep.subr.mxu0 %v1090_v0 }
 0x293   :  { %1003 = vmatpush3.msra.mxu0 %v1131_v5 }
 0x294   :  { %1004 = vmatprep.subr.mxu0 %v1090_v0 }
 0x295   :  { %1005 = vmatpush3.msra.mxu0 %v1135_v6 }
 0x296   :  { %1006 = vmatprep.subr.mxu0 %v1090_v0 }
 0x297   :  { %1007 = vmatpush3.msra.mxu0 %v1140_v7 }
 0x298   :  { %1022 = vmatprep.subr.mxu0 %v1090_v0 }
 0x350   :  { %v441_v30 = vpop.f32.mrf.mxu0 }
 0x351   :  { %v445_v31 = vadd.f32 %v441_v30, %v371_v29 }
 0x352   :  { %v988_v32 = vpop.f32.mrf.mxu0 }
 0x353   :  { %1055 = vtanh.f32 %v445_v31 }
 0x360   :  { %v1056_v33 = vpop.eup %1055 }
 0x361   :  { %448 = vst [vmem:[#allocation3 + $0x3] ss:$8 sm:$0x3] %v1056_v33  ;;  %998 = vmatmul.mubr.msk.f32.vlgmr.msra.gmra.mxu1 %vm124_vm3, %v1056_v33 }
 0x362   :  { %1012 = vmatpush3.msra.mxu1 %v1129_v4  ;;  %1019 = vmatprep.mubr.msk.f32.mxu1 %vm1091_vm0, %v1090_v0 }
 0x363   :  { %1013 = vmatprep.subr.mxu1 %v1090_v0 }
 0x364   :  { %1014 = vmatpush3.msra.mxu1 %v1131_v5 }
 0x365   :  { %1015 = vmatprep.subr.mxu1 %v1090_v0 }
 0x366   :  { %1016 = vmatpush3.msra.mxu1 %v1135_v6 }
 0x367   :  { %1017 = vmatprep.subr.mxu1 %v1090_v0 }
 0x368   :  { %1018 = vmatpush3.msra.mxu1 %v1140_v7 }
 0x369   :  { %1033 = vmatprep.subr.mxu1 %v775_v49 }
 0x421   :  { %v521_v35 = vpop.f32.mrf.mxu1 }
 0x422   :  { %v525_v36 = vadd.f32 %v521_v35, %v451_v34 }
 0x423   :  { %v999_v37 = vpop.f32.mrf.mxu1 }
 0x424   :  { %1057 = vtanh.f32 %v525_v36 }
 0x431   :  { %v1058_v38 = vpop.eup %1057 }
 0x432   :  { %528 = vst [vmem:[#allocation3 + $0x4] ss:$8 sm:$0x3] %v1058_v38  ;;  %1009 = vmatmul.mubr.msk.f32.vlgmr.msra.gmra.mxu0 %vm124_vm3, %v1058_v38 }
 0x433   :  { %1023 = vmatpush3.msra.mxu0 %v1129_v4  ;;  %1030 = vmatprep.mubr.msk.f32.mxu0 %vm1091_vm0, %v1090_v0 }
 0x434   :  { %1024 = vmatprep.subr.mxu0 %v1090_v0 }
 0x435   :  { %1025 = vmatpush3.msra.mxu0 %v1131_v5 }
 0x436   :  { %1026 = vmatprep.subr.mxu0 %v1090_v0 }
 0x437   :  { %1027 = vmatpush3.msra.mxu0 %v1135_v6 }
 0x438   :  { %1028 = vmatprep.subr.mxu0 %v1090_v0 }
 0x439   :  { %1029 = vmatpush3.msra.mxu0 %v1140_v7 }
 0x4f2   :  { %v601_v40 = vpop.f32.mrf.mxu0 }
 0x4f3   :  { %v605_v41 = vadd.f32 %v601_v40, %v531_v39 }
 0x4f4   :  { %v1010_v42 = vpop.f32.mrf.mxu0 }
 0x4f5   :  { %1059 = vtanh.f32 %v605_v41 }
 0x502   :  { %v1060_v43 = vpop.eup %1059 }
 0x503   :  { %608 = vst [vmem:[#allocation3 + $0x5] ss:$8 sm:$0x3] %v1060_v43  ;;  %1020 = vmatmul.mubr.msk.f32.vlgmr.msra.gmra.mxu1 %vm124_vm3, %v1060_v43 }
 0x504   :  { %1034 = vmatpush3.msra.mxu1 %v775_v49 }
 0x505   :  { %1035 = vmatprep.subr.mxu1 %v774_v50 }
 0x506   :  { %1036 = vmatpush3.msra.mxu1 %v774_v50 }
 0x507   :  { %1037 = vmatprep.subr.mxu1 %v773_v51 }
 0x508   :  { %1038 = vmatpush3.msra.mxu1 %v773_v51 }
 0x509   :  { %1039 = vmatprep.subr.mxu1 %v772_v52 }
 0x50a   :  { %1040 = vmatpush3.msra.mxu1 %v772_v52 }
 0x5c3   :  { %v681_v45 = vpop.f32.mrf.mxu1 }
 0x5c4   :  { %v685_v46 = vadd.f32 %v681_v45, %v611_v44 }
 0x5c5   :  { %v1021_v47 = vpop.f32.mrf.mxu1 }
 0x5c6   :  { %1061 = vtanh.f32 %v685_v46 }
 0x5d3   :  { %v1062_v48 = vpop.eup %1061 }
 0x5d4   :  { %688 = vst [vmem:[#allocation3 + $0x6] ss:$8 sm:$0x3] %v1062_v48  ;;  %1031 = vmatmul.mubr.msk.f32.vlgmr.msra.gmra.mxu0 %vm124_vm3, %v1062_v48 }
 0x694   :  { %v761_v54 = vpop.f32.mrf.mxu0 }
 0x695   :  { %v765_v55 = vadd.f32 %v761_v54, %v691_v53 }
 0x696   :  { %v1032_v56 = vpop.f32.mrf.mxu0 }
 0x697   :  { %1063 = vtanh.f32 %v765_v55 }
 0x6a4   :  { %v1064_v57 = vpop.eup %1063 }
 0x6a5   :  { %768 = vst [vmem:[#allocation3 + $0x7] ss:$8 sm:$0x3] %v1064_v57  ;;  %771 = vst.msk [vmem:[%s1242_s4] sm:$0x3] %vm770_vm4, %v1064_v57 }
 0x6ac   :  { %v777_v58 = vld [vmem:[#allocation3] sm:$0xff]  ;;  %v778_v59 = vld [vmem:[#allocation3 + $0x8] sm:$0xff] }
 0x6ad   :  { %1041 = vmatprep.mubr.msk.f32.mxu1 %vm124_vm3, %v777_v58 }
 0x6ae   :  { %1042 = vmatmul.mubr.msk.f32.vlgmr.msra.gmra.mxu1 %vm124_vm3, %v778_v59 }
 0x76e   :  { %v1043_v61 = vpop.f32.mrf.mxu1 }
 0x76f   :  { %v861_v62 = vadd.f32 %v1043_v61, %v888_v60 }
 0x770   :  { %v855_v63 = vpop.f32.mrf.mxu1 }
 0x771   :  { %866 = vst.msk [vmem:[%s1241_s3 + $0x8] sm:$0xff] %vm864_vm5, %v861_v62  ;;  %v856_v0 = vadd.f32 %v888_v60, %v855_v63 }
 0x773   :  { %865 = vst.msk [vmem:[%s1241_s3] sm:$0xff] %vm864_vm5, %v856_v0 }
 0x774   :  { %875 = vsyncpa [#allocation5], 1 }

</bundles_post_ra>
